<compile_context>
chip_gen: v6e
topology: v6e:2x2x1
jax: 0.10.0
libtpu: 0.0.40
codegen_flags: <defaults>
</compile_context>

<pallas_src>
import functools

import jax
import jax.numpy as jnp
from jax.experimental import pallas as pl
from jax.experimental.pallas import tpu as pltpu


# ----------------------------------------------------------------------------
# Pallas kernel: the entire MLP forward for one batch tile (transposed layout).
# ----------------------------------------------------------------------------
def _pinn_mlp_kernel(x_ref, win_ref, bin_ref, wh_ref, bh_ref, wout_ref,
                     bout_ref, o_ref, *, depth):
    # x_ref:   (in_dim, tile_n)      -- batch on the lane axis
    # win_ref: (width, in_dim)       -- torch-native (out, in)
    # Input layer: tanh(Win @ x + bin)
    h = jnp.tanh(
        jnp.dot(win_ref[...], x_ref[...], preferred_element_type=jnp.float32)
        + bin_ref[...])
    # Hidden layers (static unroll over small depth): tanh(W_l @ h + b_l)
    for l in range(depth):
        h = jnp.tanh(
            jnp.dot(wh_ref[l], h, preferred_element_type=jnp.float32)
            + bh_ref[l])
    # Output layer (no activation): Wout @ h + bout  -> (dd, tile_n), lane-dense
    o_ref[...] = (
        jnp.dot(wout_ref[...], h, preferred_element_type=jnp.float32)
        + bout_ref[...]).astype(o_ref.dtype)


def pinn_forward(x, p, *, depth, tile_n=2048):
    """Run the PINN MLP forward pass via a single fused Pallas kernel.

    x:  (N, 3*d) float32 (any N; padded internally to a lane-aligned tile)
    p:  dict with win (W, 3d), bin (W, 1), wh (depth, W, W), bh (depth, W, 1),
        wout (dd, W), bout (dd, 1)  -- all torch-native (out, in) orientation.
    """
    n, in_dim = x.shape
    width = p["win"].shape[0]
    dd = p["wout"].shape[0]

    # Batch tile: multiple of 128 (lane axis), capped at tile_n, and sized to
    # keep >= 2 grid steps when the batch allows (v7x has 2 TensorCores).
    tile = max(128, min(tile_n, 128 * pl.cdiv(n, 2 * 128)))
    n_pad = tile * pl.cdiv(n, tile)

    # Layout plumbing: batch -> lane (last) axis, zero-pad to the tile grid.
    xt = jnp.zeros((in_dim, n_pad), x.dtype).at[:, :n].set(x.T)

    kernel = functools.partial(_pinn_mlp_kernel, depth=depth)

    out_t = pl.pallas_call(
        kernel,
        out_shape=jax.ShapeDtypeStruct((dd, n_pad), jnp.float32),
        grid_spec=pl.GridSpec(
            grid=(n_pad // tile,),
            in_specs=[
                # batch tile of the (transposed) input
                pl.BlockSpec((in_dim, tile), lambda i: (0, i)),
                # parameters: full arrays, same block for every grid step
                pl.BlockSpec((width, in_dim), lambda i: (0, 0)),
                pl.BlockSpec((width, 1), lambda i: (0, 0)),
                pl.BlockSpec((depth, width, width), lambda i: (0, 0, 0)),
                pl.BlockSpec((depth, width, 1), lambda i: (0, 0, 0)),
                pl.BlockSpec((dd, width), lambda i: (0, 0)),
                pl.BlockSpec((dd, 1), lambda i: (0, 0)),
            ],
            out_specs=pl.BlockSpec((dd, tile), lambda i: (0, i)),
        ),
        compiler_params=pltpu.CompilerParams(
            dimension_semantics=("parallel",)),
    )(xt, p["win"], p["bin"], p["wh"], p["bh"], p["wout"], p["bout"])

    # Back to (N, dd), dropping the padded rows.
    return out_t.T[:n]


# ----------------------------------------------------------------------------
# Deterministic parameter init (mimics torch.nn.Linear default: U(-k, k),
# k = 1/sqrt(fan_in)), plus a pure-JAX reference for verification.
# ----------------------------------------------------------------------------
def init_params(key, d, width, depth, dd):
    in_dim = 3 * d
    keys = jax.random.split(key, 2 * (depth + 2))

    def uniform(k, shape, fan_in):
        bound = 1.0 / jnp.sqrt(jnp.float32(fan_in))
        return jax.random.uniform(k, shape, jnp.float32, -bound, bound)

    win = uniform(keys[0], (width, in_dim), in_dim)          # (out, in)
    bin_ = uniform(keys[1], (width, 1), in_dim)
    wh = jnp.stack(
        [uniform(keys[2 + 2 * l], (width, width), width) for l in range(depth)])
    bh = jnp.stack(
        [uniform(keys[3 + 2 * l], (width, 1), width) for l in range(depth)])
    wout = uniform(keys[2 + 2 * depth], (dd, width), width)
    bout = uniform(keys[3 + 2 * depth], (dd, 1), width)
    return {"win": win, "bin": bin_, "wh": wh, "bh": bh,
            "wout": wout, "bout": bout}


def pinn_reference(x, p, depth):
    h = jnp.tanh(x @ p["win"].T + p["bin"].T)
    for l in range(depth):
        h = jnp.tanh(h @ p["wh"][l].T + p["bh"][l].T)
    return h @ p["wout"].T + p["bout"].T


if __name__ == "__main__":
    # Shapes consistent with the module: params = {'d': 2, 'width': 32,
    # 'depth': 3, 'dd': 4}.  Input feature dim = 3*d = 6.
    # batch=1000 is intentionally NOT a multiple of the tile (exercises the
    # padding path) and yields 2 parallel grid steps of 512 rows each.
    d, width, depth, dd = 2, 32, 3, 4
    batch = 1000

    key = jax.random.PRNGKey(0)
    kx, kp = jax.random.split(key)
    x = jax.random.normal(kx, (batch, 3 * d), dtype=jnp.float32)
    params = init_params(kp, d, width, depth, dd)

    out = pinn_forward(x, params, depth=depth)
    out = jax.block_until_ready(out)

    ref = pinn_reference(x, params, depth)
    assert out.shape == (batch, dd)
    assert jnp.allclose(out, ref, atol=1e-4, rtol=1e-4), "mismatch vs reference"

    print("KERNEL_OK")
</pallas_src>

<mosaic_0001>
module attributes {stable_mosaic.version = 11 : i64} {
  func.func @_pinn_mlp_kernel(%arg0: i32, %arg1: memref<6x512xf32, #tpu.memory_space<vmem>>, %arg2: memref<32x6xf32, #tpu.memory_space<vmem>>, %arg3: memref<32x1xf32, #tpu.memory_space<vmem>>, %arg4: memref<3x32x32xf32, #tpu.memory_space<vmem>>, %arg5: memref<3x32x1xf32, #tpu.memory_space<vmem>>, %arg6: memref<4x32xf32, #tpu.memory_space<vmem>>, %arg7: memref<4x1xf32, #tpu.memory_space<vmem>>, %arg8: memref<4x512xf32, #tpu.memory_space<vmem>>) attributes {dimension_semantics = [#tpu.dimension_semantics<parallel>], iteration_bounds = array<i64: 2>, scalar_prefetch = 0 : i64, scratch_operands = 0 : i64, tpu.core_type = #tpu.core_type<tc>, window_params = [{transform_indices = @transform_0, window_bounds = array<i64: 6, 512>}, {pipeline_mode = #tpu.pipeline_mode<synchronous>, transform_indices = @transform_1, window_bounds = array<i64: 32, 6>}, {pipeline_mode = #tpu.pipeline_mode<synchronous>, transform_indices = @transform_2, window_bounds = array<i64: 32, 1>}, {pipeline_mode = #tpu.pipeline_mode<synchronous>, transform_indices = @transform_3, window_bounds = array<i64: 3, 32, 32>}, {pipeline_mode = #tpu.pipeline_mode<synchronous>, transform_indices = @transform_4, window_bounds = array<i64: 3, 32, 1>}, {pipeline_mode = #tpu.pipeline_mode<synchronous>, transform_indices = @transform_5, window_bounds = array<i64: 4, 32>}, {pipeline_mode = #tpu.pipeline_mode<synchronous>, transform_indices = @transform_6, window_bounds = array<i64: 4, 1>}, {transform_indices = @transform_7, window_bounds = array<i64: 4, 512>}]} {
    %c0 = arith.constant 0 : index
    %c0_0 = arith.constant 0 : index
    %0 = vector.load %arg2[%c0, %c0_0] : memref<32x6xf32, #tpu.memory_space<vmem>>, vector<32x6xf32>
    %c0_1 = arith.constant 0 : index
    %c0_2 = arith.constant 0 : index
    %1 = vector.load %arg1[%c0_1, %c0_2] : memref<6x512xf32, #tpu.memory_space<vmem>>, vector<6x512xf32>
    %cst = arith.constant dense<0.000000e+00> : vector<32x512xf32>
    %2 = tpu.matmul %0, %1, %cst {dimension_numbers = #tpu.dot_dimension_numbers<[1], [0], [0], [1], [0, 0, 1, 1], [], []>} : vector<32x6xf32>, vector<6x512xf32>, vector<32x512xf32> -> vector<32x512xf32>
    %c0_3 = arith.constant 0 : index
    %c0_4 = arith.constant 0 : index
    %3 = vector.load %arg3[%c0_3, %c0_4] : memref<32x1xf32, #tpu.memory_space<vmem>>, vector<32x1xf32>
    %4 = vector.broadcast %3 : vector<32x1xf32> to vector<32x512xf32>
    %5 = arith.addf %2, %4 : vector<32x512xf32>
    %6 = math.tanh %5 : vector<32x512xf32>
    %c0_5 = arith.constant 0 : index
    %c0_6 = arith.constant 0 : index
    %c0_7 = arith.constant 0 : index
    %7 = vector.load %arg4[%c0_5, %c0_6, %c0_7] : memref<3x32x32xf32, #tpu.memory_space<vmem>>, vector<1x32x32xf32>
    %8 = vector.shape_cast %7 : vector<1x32x32xf32> to vector<32x32xf32>
    %cst_8 = arith.constant dense<0.000000e+00> : vector<32x512xf32>
    %9 = tpu.matmul %8, %6, %cst_8 {dimension_numbers = #tpu.dot_dimension_numbers<[1], [0], [0], [1], [0, 0, 1, 1], [], []>} : vector<32x32xf32>, vector<32x512xf32>, vector<32x512xf32> -> vector<32x512xf32>
    %c0_9 = arith.constant 0 : index
    %c0_10 = arith.constant 0 : index
    %c0_11 = arith.constant 0 : index
    %10 = vector.load %arg5[%c0_9, %c0_10, %c0_11] : memref<3x32x1xf32, #tpu.memory_space<vmem>>, vector<1x32x1xf32>
    %11 = vector.shape_cast %10 : vector<1x32x1xf32> to vector<32x1xf32>
    %12 = vector.broadcast %11 : vector<32x1xf32> to vector<32x512xf32>
    %13 = arith.addf %9, %12 : vector<32x512xf32>
    %14 = math.tanh %13 : vector<32x512xf32>
    %c1 = arith.constant 1 : index
    %c0_12 = arith.constant 0 : index
    %c0_13 = arith.constant 0 : index
    %15 = vector.load %arg4[%c1, %c0_12, %c0_13] : memref<3x32x32xf32, #tpu.memory_space<vmem>>, vector<1x32x32xf32>
    %16 = vector.shape_cast %15 : vector<1x32x32xf32> to vector<32x32xf32>
    %cst_14 = arith.constant dense<0.000000e+00> : vector<32x512xf32>
    %17 = tpu.matmul %16, %14, %cst_14 {dimension_numbers = #tpu.dot_dimension_numbers<[1], [0], [0], [1], [0, 0, 1, 1], [], []>} : vector<32x32xf32>, vector<32x512xf32>, vector<32x512xf32> -> vector<32x512xf32>
    %c1_15 = arith.constant 1 : index
    %c0_16 = arith.constant 0 : index
    %c0_17 = arith.constant 0 : index
    %18 = vector.load %arg5[%c1_15, %c0_16, %c0_17] : memref<3x32x1xf32, #tpu.memory_space<vmem>>, vector<1x32x1xf32>
    %19 = vector.shape_cast %18 : vector<1x32x1xf32> to vector<32x1xf32>
    %20 = vector.broadcast %19 : vector<32x1xf32> to vector<32x512xf32>
    %21 = arith.addf %17, %20 : vector<32x512xf32>
    %22 = math.tanh %21 : vector<32x512xf32>
    %c2 = arith.constant 2 : index
    %c0_18 = arith.constant 0 : index
    %c0_19 = arith.constant 0 : index
    %23 = vector.load %arg4[%c2, %c0_18, %c0_19] : memref<3x32x32xf32, #tpu.memory_space<vmem>>, vector<1x32x32xf32>
    %24 = vector.shape_cast %23 : vector<1x32x32xf32> to vector<32x32xf32>
    %cst_20 = arith.constant dense<0.000000e+00> : vector<32x512xf32>
    %25 = tpu.matmul %24, %22, %cst_20 {dimension_numbers = #tpu.dot_dimension_numbers<[1], [0], [0], [1], [0, 0, 1, 1], [], []>} : vector<32x32xf32>, vector<32x512xf32>, vector<32x512xf32> -> vector<32x512xf32>
    %c2_21 = arith.constant 2 : index
    %c0_22 = arith.constant 0 : index
    %c0_23 = arith.constant 0 : index
    %26 = vector.load %arg5[%c2_21, %c0_22, %c0_23] : memref<3x32x1xf32, #tpu.memory_space<vmem>>, vector<1x32x1xf32>
    %27 = vector.shape_cast %26 : vector<1x32x1xf32> to vector<32x1xf32>
    %28 = vector.broadcast %27 : vector<32x1xf32> to vector<32x512xf32>
    %29 = arith.addf %25, %28 : vector<32x512xf32>
    %30 = math.tanh %29 : vector<32x512xf32>
    %c0_24 = arith.constant 0 : index
    %c0_25 = arith.constant 0 : index
    %31 = vector.load %arg6[%c0_24, %c0_25] : memref<4x32xf32, #tpu.memory_space<vmem>>, vector<4x32xf32>
    %cst_26 = arith.constant dense<0.000000e+00> : vector<4x512xf32>
    %32 = tpu.matmul %31, %30, %cst_26 {dimension_numbers = #tpu.dot_dimension_numbers<[1], [0], [0], [1], [0, 0, 1, 1], [], []>} : vector<4x32xf32>, vector<32x512xf32>, vector<4x512xf32> -> vector<4x512xf32>
    %c0_27 = arith.constant 0 : index
    %c0_28 = arith.constant 0 : index
    %33 = vector.load %arg7[%c0_27, %c0_28] : memref<4x1xf32, #tpu.memory_space<vmem>>, vector<4x1xf32>
    %34 = vector.broadcast %33 : vector<4x1xf32> to vector<4x512xf32>
    %35 = arith.addf %32, %34 : vector<4x512xf32>
    %c0_29 = arith.constant 0 : index
    %c0_30 = arith.constant 0 : index
    %36 = vector.load %arg8[%c0_29, %c0_30] : memref<4x512xf32, #tpu.memory_space<vmem>>, vector<4x512xf32>
    tpu.vector_store %arg8[%c0_29, %c0_30], %35 {strides = array<i32>} : memref<4x512xf32, #tpu.memory_space<vmem>>, vector<4x512xf32>,
    return
  }
  func.func @transform_0(%arg0: i32) -> (i32, i32) {
    %c0_i32 = arith.constant 0 : i32
    %c0_i32_0 = arith.constant 0 : i32
    return %c0_i32, %arg0 : i32, i32
  }
  func.func @transform_1(%arg0: i32) -> (i32, i32) {
    %c0_i32 = arith.constant 0 : i32
    %c0_i32_0 = arith.constant 0 : i32
    %c0_i32_1 = arith.constant 0 : i32
    return %c0_i32, %c0_i32_0 : i32, i32
  }
  func.func @transform_2(%arg0: i32) -> (i32, i32) {
    %c0_i32 = arith.constant 0 : i32
    %c0_i32_0 = arith.constant 0 : i32
    %c0_i32_1 = arith.constant 0 : i32
    return %c0_i32, %c0_i32_0 : i32, i32
  }
  func.func @transform_3(%arg0: i32) -> (i32, i32, i32) {
    %c0_i32 = arith.constant 0 : i32
    %c0_i32_0 = arith.constant 0 : i32
    %c0_i32_1 = arith.constant 0 : i32
    %c0_i32_2 = arith.constant 0 : i32
    return %c0_i32, %c0_i32_0, %c0_i32_1 : i32, i32, i32
  }
  func.func @transform_4(%arg0: i32) -> (i32, i32, i32) {
    %c0_i32 = arith.constant 0 : i32
    %c0_i32_0 = arith.constant 0 : i32
    %c0_i32_1 = arith.constant 0 : i32
    %c0_i32_2 = arith.constant 0 : i32
    return %c0_i32, %c0_i32_0, %c0_i32_1 : i32, i32, i32
  }
  func.func @transform_5(%arg0: i32) -> (i32, i32) {
    %c0_i32 = arith.constant 0 : i32
    %c0_i32_0 = arith.constant 0 : i32
    %c0_i32_1 = arith.constant 0 : i32
    return %c0_i32, %c0_i32_0 : i32, i32
  }
  func.func @transform_6(%arg0: i32) -> (i32, i32) {
    %c0_i32 = arith.constant 0 : i32
    %c0_i32_0 = arith.constant 0 : i32
    %c0_i32_1 = arith.constant 0 : i32
    return %c0_i32, %c0_i32_0 : i32, i32
  }
  func.func @transform_7(%arg0: i32) -> (i32, i32) {
    %c0_i32 = arith.constant 0 : i32
    %c0_i32_0 = arith.constant 0 : i32
    return %c0_i32, %arg0 : i32, i32
  }
}

</mosaic_0001>

<bundles_post_ra>
// kernel: tpu_custom_call.1
= control target key start
LH: loop header
LB: loop body
LE: loop exit
PB: predicated region body
PF: predicated region fallthrough
CT: control target
= control target key end

     0   :  { %12 = vsyncpa [#allocation3], 0  ;;  %s2080_s0 = inlined_call_operand.vmem [shape: f32[6,1024], index: 0, kind: input, shape index: {}]   ;;  %s2081_s1 = inlined_call_operand.vmem [shape: f32[32,6], index: 1, kind: input, shape index: {}]   ;;  %s2082_s2 = inlined_call_operand.vmem [shape: f32[32,1], index: 2, kind: input, shape index: {}]   ;;  %s2083_s3 = inlined_call_operand.vmem [shape: f32[3,32,32], index: 3, kind: input, shape index: {}]   ;;  %s2084_s4 = inlined_call_operand.vmem [shape: f32[3,32,1], index: 4, kind: input, shape index: {}]   ;;  %s2085_s5 = inlined_call_operand.vmem [shape: f32[4,32], index: 5, kind: input, shape index: {}]   ;;  %s2086_s6 = inlined_call_operand.vmem [shape: f32[4,1], index: 6, kind: input, shape index: {}]   ;;  %s2087_s7 = inlined_call_operand.hbm [shape: f32[4,1024], index: 7, kind: output, shape index: {}]  }
   0x1   :  { %14 = vsyncpa [#allocation3 + $0x1], 0  ;;  %s1818_s24 = smov 0   ;;  %s1820_s25 = smov 0  }
   0x2   :  { %s1822_s26 = smov 0   ;;  %s1824_s27 = smov 0  }
   0x3 LB: > { %s1839_s28 = sadd.s32 4294967295, %s1773_s27   ;;  %s1475_s29 = sadd.s32 4294967294, %s1773_s27   ;;  %s1773_s27 = sphi %s1824_s27, %s2093_s27   ;;  %s1769_s26 = sphi %s1822_s26, %s2092_s26   ;;  %s1765_s25 = sphi %s1820_s25, %s2091_s25   ;;  %s1761_s24 = sphi %s1818_s24, %s2090_s24  }
   0x4   : > { %s1843_s30 = sadd.s32 1, %s1773_s27   ;;  %s179_s8 = sadd.s32 1, %s1769_s26 }
   0x5   : > { %s176_s9 = ssub.s32 %s1773_s27, %s1843_s30  ;;  %p189_p0 = scmp.ne.s32.totalorder %s1769_s26, %s1765_s25 }
   0x6   : > { %p177_p1 = scmp.eq.s32.totalorder %s176_s9, 0  ;;  %p190_p2 = scmp.eq.s32.totalorder %s1839_s28, 1 }
   0x7   : > { %p195_p3 = scmp.ne.s32.totalorder %s1765_s25, %s1761_s24  ;;  %p196_p4 = scmp.eq.s32.totalorder %s1475_s29, 1 }
   0x8   : > { %s1854_s10 = scalar_select %p177_p1, %s1769_s26, %s179_s8  }
   0x9   : > { %p1856_p5 = por %p190_p2, %p189_p0  ;;  %p1860_p6 = por %p196_p4, %p195_p3 }
   0xa   : > { %p1478_p7 = scmp.ge.s32.totalorder %s1773_s27, 1  ;;  %p241_p8 = scmp.lt.s32.totalorder %s1773_s27, 3 }
   0xc   : > { %p242_p9 = pnand %p1478_p7, %p241_p8 }
   0xd   : > { %s1480_s13 = sshll.u32 (!%p242_p9), %s1839_s28, 2  ;;  %s270_s16 = sand.u32 (!%p242_p9), 1, %s1765_s25  }
   0xe   : > { %245 = sbr.rel (%p242_p9) target bundleno = 1162 (0x48a), region = 48  ;;  %p274_p10 = scmp.lt.s32.totalorder (!%p242_p9), %s1480_s13, 7 }
   0xf   : > { %s1479_s17 = sshll.u32 (!%p242_p9), %s270_s16, 4  ;;  %s1541_s18 = sshll.u32 (!%p242_p9), %s1839_s28, 8 }
  0x10   : > { %s272_s19 = scalar_lea.vmem (!%p242_p9), [#allocation2], %s1479_s17  ;;  %s2045_s23 = scalar_lea.hbm (!%p242_p9), %s2087_s7, %s1541_s18 }
  0x11   : > { %s1416_s20 = sshll.u32 (!%p242_p9), %s272_s19, 4  ;;  %s1402_s29 = scalar_lea.sflag (!%p242_p9), [#allocation3], %s270_s16  ;;  %s1417_s20 = int_to_ptr.vmem [resolvable:$true] %s1416_s20 }
  0x12   : > { %s1777_s28 = smov (!%p242_p9), [#allocation2]  }
  0x13   : > { %v1775_v0 = vmov 0.0   ;;  %v291_v1 = vld [vmem:[%s2082_s2 + $0x18] sm:$0xff]  ;;  %v1776_v2 = vmov 0   ;;  %v289_v3 = vld [vmem:[%s2082_s2 + $0x8] sm:$0xff]  ;;  %s2095_s13 = smov (!%p274_p10, %s1480_s13), 7  ;;  %v290_v4 = vld [vmem:[%s2082_s2 + $0x10] sm:$0xff] }
  0x14   : > { %402 = vmatprep.mubr.f32.mxu0 %v1775_v0  ;;  %491 = vmatprep.mubr.f32.mxu1 %v1775_v0  ;;  %v288_v5 = vld [vmem:[%s2082_s2] sm:$0xff]  ;;  %s1481_s22 = sshll.u32 %s2095_s13, 3  ;;  %vm325_vm0 = vcmask 1045504   ;;  %vm312_vm1 = vcmask 48128   ;;  %v539_v11 = vld [vmem:[%s2084_s4 + $0x18] sm:$0xff]  ;;  %v538_v12 = vld [vmem:[%s2084_s4 + $0x10] sm:$0xff] }
  0x15   : > { %1583 = vset.pattern.permute.xlu0 %v1776_v2  ;;  %1584 = vset.pattern.permute.xlu1 %v1776_v2  ;;  %s277_s8 = scalar_lea.vmem %s2080_s0, %s1481_s22  ;;  %v280_v6 = vld [vmem:[%s2081_s1] sm:$0xff]  ;;  %v281_v13 = vld [vmem:[%s2081_s1 + $0x8] sm:$0xff]  ;;  %v282_v16 = vld [vmem:[%s2081_s1 + $0x10] sm:$0xff]  ;;  %vm560_vm2 = vcmask 261120   ;;  %s1717_s9 = sshll.u32 %s1777_s28, 4  ;;  %s1718_s9 = int_to_ptr.vmem [resolvable:$false] %s1717_s9 }
  0x16   : > { %309 = vperm.xlu0 %1583, %v291_v1   ;;  %299 = vperm.xlu1 %1584, %v289_v3   ;;  %v285_v7 = vld [vmem:[%s277_s8 + $0x8] sm:$0x3f]  ;;  %v287_v8 = vld [vmem:[%s277_s8 + $0x18] sm:$0x3f]  ;;  %v284_v9 = vld [vmem:[%s277_s8] sm:$0x3f]  ;;  %p1720_p0 = scmp.lt.s32.totalorder %s1417_s20, %s1718_s9 }
  0x17   : > { %1482 = vmatprep.subr.msk.mxu0 %vm325_vm0, %v285_v7  ;;  %1488 = vmatprep.subr.msk.mxu1 %vm325_vm0, %v287_v8  ;;  %v286_v10 = vld [vmem:[%s277_s8 + $0x10] sm:$0x3f]  ;;  %v537_v14 = vld [vmem:[%s2084_s4 + $0x8] sm:$0xff]  ;;  %v536_v15 = vld [vmem:[%s2084_s4] sm:$0xff]  ;;  %s1713_s8 = scalar_lea.vmem %s1417_s20, 256  ;;  %s1719_s14 = scalar_lea.vmem %s1718_s9, 512 }
  0x18   : > { %1483 = vmatpush1.msk.msra.mxu0 %vm325_vm0, %v284_v9  ;;  %1489 = vmatpush1.msk.msra.mxu1 %vm325_vm0, %v286_v10  ;;  %v1509_v17 = vld [vmem:[%s2084_s4 + $0x38] sm:$0xff]  ;;  %v1508_v18 = vld [vmem:[%s2084_s4 + $0x30] sm:$0xff]  ;;  %v1507_v20 = vld [vmem:[%s2084_s4 + $0x28] sm:$0xff]  ;;  %p1714_p11 = scmp.ne.s32.totalorder %s1417_s20, %s1713_s8  ;;  %p1721_p1 = scmp.lt.s32.totalorder %s1719_s14, %s1713_s8 }
  0x19   : > { %1484 = vmatmul.mubr.msk.f32.vlgmr.msra.gmra.mxu0 %vm312_vm1, %v280_v6  ;;  %1490 = vmatmul.mubr.msk.f32.vlgmr.msra.gmra.mxu1 %vm312_vm1, %v280_v6  ;;  %v283_v19 = vld [vmem:[%s2081_s1 + $0x18] sm:$0xff]  ;;  %v1506_v21 = vld [vmem:[%s2084_s4 + $0x20] sm:$0xff]  ;;  %v1524_v23 = vld [vmem:[%s2084_s4 + $0x50] sm:$0xff] }
  0x1a   : > { %304 = vperm.xlu0 %1583, %v290_v4   ;;  %294 = vperm.xlu1 %1584, %v288_v5   ;;  %v1525_v22 = vld [vmem:[%s2084_s4 + $0x58] sm:$0xff]  ;;  %v1523_v24 = vld [vmem:[%s2084_s4 + $0x48] sm:$0xff]  ;;  %v1522_v25 = vld [vmem:[%s2084_s4 + $0x40] sm:$0xff]  ;;  %p1715_p12 = pnand %p1714_p11, %p1856_p5  ;;  %p1722_p2 = por %p1721_p1, %p1720_p0 }
  0x1b   : > { %408 = vmatprep.mubr.f32.mxu0 %v1775_v0  ;;  %497 = vmatprep.mubr.f32.mxu1 %v1775_v0  ;;  %v1240_v26 = vld [vmem:[%s2086_s6] sm:$0xf] }
  0x1c   : > { %p1716_p13 = pneg %p1715_p12 }
  0x1d   : > { %1485 = vmatmul.mubr.msk.f32.gmra.mxu0 %vm312_vm1, %v281_v13  ;;  %1491 = vmatmul.mubr.msk.f32.gmra.mxu1 %vm312_vm1, %v281_v13 }
  0x1e   : > { %557 = vperm.xlu0 %1583, %v539_v11   ;;  %552 = vperm.xlu1 %1584, %v538_v12   ;;  %p1723_p3 = pnand %p1722_p2, %p1716_p13 }
  0x1f   : > { %414 = vmatprep.mubr.f32.mxu0 %v1775_v0  ;;  %503 = vmatprep.mubr.f32.mxu1 %v1775_v0 }
  0x21   : > { %1486 = vmatmul.mubr.msk.f32.gmra.mxu0 %vm312_vm1, %v282_v16  ;;  %1492 = vmatmul.mubr.msk.f32.gmra.mxu1 %vm312_vm1, %v282_v16 }
  0x22   : > { %547 = vperm.xlu0 %1583, %v537_v14   ;;  %542 = vperm.xlu1 %1584, %v536_v15   ;;  %v532_v14 = vld [vmem:[%s2083_s3] sm:$0xff] }
  0x23   : > { %420 = vmatprep.mubr.f32.mxu0 %v1775_v0  ;;  %509 = vmatprep.mubr.f32.mxu1 %v1775_v0 }
  0x25   : > { %1487 = vmatmul.mubr.msk.f32.gmra.mxu0 %vm312_vm1, %v283_v19  ;;  %1493 = vmatmul.mubr.msk.f32.gmra.mxu1 %vm312_vm1, %v283_v19  ;;  %v535_v19 = vld [vmem:[%s2083_s3 + $0x18] sm:$0xff] }
  0x26   : > { %794 = vperm.xlu0 %1583, %v1509_v17   ;;  %789 = vperm.xlu1 %1584, %v1508_v18   ;;  %v533_v17 = vld [vmem:[%s2083_s3 + $0x8] sm:$0xff]  ;;  %v534_v18 = vld [vmem:[%s2083_s3 + $0x10] sm:$0xff] }
  0x27   : > { %637 = vmatprep.mubr.f32.mxu0 %v1775_v0  ;;  %726 = vmatprep.mubr.f32.mxu1 %v1775_v0 }
  0x2a   : > { %784 = vperm.xlu0 %1583, %v1507_v20   ;;  %779 = vperm.xlu1 %1584, %v1506_v21  }
  0x2e   : > { %1030 = vperm.xlu0 %1583, %v1525_v22   ;;  %1025 = vperm.xlu1 %1584, %v1524_v23  }
  0x32   : > { %1020 = vperm.xlu0 %1583, %v1523_v24   ;;  %1015 = vperm.xlu1 %1584, %v1522_v25  }
  0x36   : > { %1243 = vperm.xlu0 %1583, %v1240_v26  }
  0x91   : > { %v300_v27 = vpop.permute.xlu1 %299  ;;  %v310_v32 = vpop.permute.xlu0 %309 }
  0x95   : > { %v295_v35 = vpop.permute.xlu1 %294  ;;  %v305_v43 = vpop.permute.xlu0 %304 }
  0x99   : > { %v553_v20 = vpop.permute.xlu1 %552  ;;  %v558_v22 = vpop.permute.xlu0 %557 }
  0xd9   : > { %v404_v28 = vpop.f32.mrf.mxu0  ;;  %v493_v29 = vpop.f32.mrf.mxu1 }
  0xda   : > { %v405_v36 = vadd.f32 %v404_v28, %v295_v35  ;;  %v494_v62 = vadd.f32 %v493_v29, %v295_v35 }
  0xdb   : > { %v406_v30 = vpop.f32.mrf.mxu0  ;;  %v495_v31 = vpop.f32.mrf.mxu1 }
  0xdc   : > { %v407_v39 = vadd.f32 %v406_v30, %v295_v35  ;;  %1585 = vtanh.f32 %v405_v36  ;;  %v496_v61 = vadd.f32 %v495_v31, %v295_v35  ;;  %v548_v31 = vpop.permute.xlu0 %547 }
  0xdd   : > { %v410_v33 = vpop.f32.mrf.mxu0  ;;  %v499_v34 = vpop.f32.mrf.mxu1 }
  0xde   : > { %v411_v40 = vadd.f32 %v410_v33, %v300_v27  ;;  %1587 = vtanh.f32 %v407_v39  ;;  %v500_v60 = vadd.f32 %v499_v34, %v300_v27 }
  0xdf   : > { %v412_v37 = vpop.f32.mrf.mxu0  ;;  %v501_v38 = vpop.f32.mrf.mxu1 }
  0xe0   : > { %v413_v44 = vadd.f32 %v412_v37, %v300_v27  ;;  %1589 = vtanh.f32 %v411_v40  ;;  %v502_v59 = vadd.f32 %v501_v38, %v300_v27  ;;  %v543_v27 = vpop.permute.xlu1 %542 }
  0xe1   : > { %v416_v41 = vpop.f32.mrf.mxu0  ;;  %v505_v42 = vpop.f32.mrf.mxu1 }
  0xe2   : > { %v417_v45 = vadd.f32 %v416_v41, %v305_v43  ;;  %1591 = vtanh.f32 %v413_v44  ;;  %v506_v58 = vadd.f32 %v505_v42, %v305_v43 }
  0xe3   : > { %v418_v46 = vpop.f32.mrf.mxu0  ;;  %v507_v47 = vpop.f32.mrf.mxu1 }
  0xe4   : > { %v419_v48 = vadd.f32 %v418_v46, %v305_v43  ;;  %1593 = vtanh.f32 %v417_v45  ;;  %v508_v57 = vadd.f32 %v507_v47, %v305_v43 }
  0xe5   : > { %v422_v49 = vpop.f32.mrf.mxu0  ;;  %v511_v50 = vpop.f32.mrf.mxu1 }
  0xe6   : > { %v423_v51 = vadd.f32 %v422_v49, %v310_v32  ;;  %1595 = vtanh.f32 %v419_v48  ;;  %v512_v54 = vadd.f32 %v511_v50, %v310_v32 }
  0xe7   : > { %v424_v52 = vpop.f32.mrf.mxu0  ;;  %v513_v53 = vpop.f32.mrf.mxu1 }
  0xe8   : > { %v425_v55 = vadd.f32 %v424_v52, %v310_v32  ;;  %v514_v56 = vadd.f32 %v513_v53, %v310_v32  ;;  %1597 = vtanh.f32 %v423_v51 }
  0xe9   : > { %v1586_v63 = vpop.eup %1585 }
  0xea   : > { %1599 = vtanh.f32 %v425_v55 }
  0xeb   : > { %1601 = vtanh.f32 %v514_v56  ;;  %v1588_v1 = vpop.eup %1587 }
  0xec   : > { %1603 = vtanh.f32 %v512_v54 }
  0xed   : > { %1605 = vtanh.f32 %v508_v57  ;;  %v1590_v2 = vpop.eup %1589 }
  0xee   : > { %1607 = vtanh.f32 %v506_v58 }
  0xef   : > { %1609 = vtanh.f32 %v502_v59  ;;  %v1592_v3 = vpop.eup %1591 }
  0xf0   : > { %1611 = vtanh.f32 %v500_v60 }
  0xf1   : > { %1613 = vtanh.f32 %v496_v61  ;;  %v1594_v4 = vpop.eup %1593 }
  0xf2   : > { %1615 = vtanh.f32 %v494_v62 }
  0xf3   : > { %v1596_v5 = vpop.eup %1595 }
  0xf5   : > { %v1598_v6 = vpop.eup %1597 }
  0xf7   : > { %v1600_v7 = vpop.eup %1599 }
  0xf8   : > { %v1602_v8 = vpop.eup %1601  ;;  %597 = vmatprep.subr.mxu0 %v1600_v7  ;;  %v1502_v7 = vld [vmem:[%s2083_s3 + $0x20] sm:$0xff] }
  0xf9   : > { %v1604_v9 = vpop.eup %1603  ;;  %686 = vmatprep.subr.mxu1 %v1602_v8  ;;  %598 = vmatpush1.msra.mxu0 %v1598_v6 }
  0xfa   : > { %v1606_v10 = vpop.eup %1605  ;;  %687 = vmatpush1.msra.mxu1 %v1604_v9  ;;  %599 = vmatprep.subr.mxu0 %v1596_v5 }
  0xfb   : > { %v1608_v11 = vpop.eup %1607  ;;  %688 = vmatprep.subr.mxu1 %v1606_v10  ;;  %600 = vmatpush1.msra.mxu0 %v1594_v4  ;;  %v1503_v10 = vld [vmem:[%s2083_s3 + $0x28] sm:$0xff] }
  0xfc   : > { %v1610_v12 = vpop.eup %1609  ;;  %689 = vmatpush1.msra.mxu1 %v1608_v11  ;;  %601 = vmatprep.subr.mxu0 %v1592_v3  ;;  %v1504_v11 = vld [vmem:[%s2083_s3 + $0x30] sm:$0xff] }
  0xfd   : > { %v1612_v13 = vpop.eup %1611  ;;  %690 = vmatprep.subr.mxu1 %v1610_v12  ;;  %602 = vmatpush1.msra.mxu0 %v1590_v2  ;;  %v1505_v12 = vld [vmem:[%s2083_s3 + $0x38] sm:$0xff] }
  0xfe   : > { %v1614_v15 = vpop.eup %1613  ;;  %691 = vmatpush1.msra.mxu1 %v1612_v13  ;;  %603 = vmatprep.subr.mxu0 %v1588_v1  ;;  %v790_v13 = vpop.permute.xlu1 %789 }
  0xff   : > { %v1616_v16 = vpop.eup %1615  ;;  %692 = vmatprep.subr.mxu1 %v1614_v15  ;;  %604 = vmatpush1.msra.mxu0 %v1586_v63  ;;  %v795_v15 = vpop.permute.xlu0 %794 }
 0x100   : > { %693 = vmatpush1.msra.mxu1 %v1616_v16  ;;  %1494 = vmatmul.mubr.msk.f32.vlgmr.msra.gmra.mxu0 %vm560_vm2, %v532_v14 }
 0x101   : > { %1498 = vmatmul.mubr.msk.f32.vlgmr.msra.gmra.mxu1 %vm560_vm2, %v532_v14  ;;  %643 = vmatprep.mubr.f32.mxu0 %v1775_v0 }
 0x102   : > { %732 = vmatprep.mubr.f32.mxu1 %v1775_v0 }
 0x104   : > { %1495 = vmatmul.mubr.msk.f32.gmra.mxu0 %vm560_vm2, %v533_v17 }
 0x105   : > { %1499 = vmatmul.mubr.msk.f32.gmra.mxu1 %vm560_vm2, %v533_v17  ;;  %649 = vmatprep.mubr.f32.mxu0 %v1775_v0 }
 0x106   : > { %738 = vmatprep.mubr.f32.mxu1 %v1775_v0 }
 0x108   : > { %1496 = vmatmul.mubr.msk.f32.gmra.mxu0 %vm560_vm2, %v534_v18 }
 0x109   : > { %1500 = vmatmul.mubr.msk.f32.gmra.mxu1 %vm560_vm2, %v534_v18  ;;  %655 = vmatprep.mubr.f32.mxu0 %v1775_v0 }
 0x10a   : > { %744 = vmatprep.mubr.f32.mxu1 %v1775_v0 }
 0x10c   : > { %1497 = vmatmul.mubr.msk.f32.gmra.mxu0 %vm560_vm2, %v535_v19 }
 0x10d   : > { %1501 = vmatmul.mubr.msk.f32.gmra.mxu1 %vm560_vm2, %v535_v19  ;;  %873 = vmatprep.mubr.f32.mxu0 %v1775_v0 }
 0x10e   : > { %962 = vmatprep.mubr.f32.mxu1 %v1775_v0 }
 0x1c0   : > { %v639_v21 = vpop.f32.mrf.mxu0 }
 0x1c1   : > { %v728_v23 = vpop.f32.mrf.mxu1  ;;  %v640_v29 = vadd.f32 %v639_v21, %v543_v27 }
 0x1c2   : > { %v641_v24 = vpop.f32.mrf.mxu0  ;;  %v729_v55 = vadd.f32 %v728_v23, %v543_v27 }
 0x1c3   : > { %v730_v25 = vpop.f32.mrf.mxu1  ;;  %v642_v32 = vadd.f32 %v641_v24, %v543_v27  ;;  %1617 = vtanh.f32 %v640_v29  ;;  %v785_v24 = vpop.permute.xlu0 %784 }
 0x1c4   : > { %v645_v26 = vpop.f32.mrf.mxu0  ;;  %v731_v54 = vadd.f32 %v730_v25, %v543_v27 }
 0x1c5   : > { %v734_v28 = vpop.f32.mrf.mxu1  ;;  %v646_v34 = vadd.f32 %v645_v26, %v548_v31  ;;  %1619 = vtanh.f32 %v642_v32 }
 0x1c6   : > { %v647_v30 = vpop.f32.mrf.mxu0  ;;  %v735_v53 = vadd.f32 %v734_v28, %v548_v31 }
 0x1c7   : > { %v736_v33 = vpop.f32.mrf.mxu1  ;;  %v648_v36 = vadd.f32 %v647_v30, %v548_v31  ;;  %1621 = vtanh.f32 %v646_v34 }
 0x1c8   : > { %v651_v35 = vpop.f32.mrf.mxu0  ;;  %v737_v52 = vadd.f32 %v736_v33, %v548_v31 }
 0x1c9   : > { %v740_v37 = vpop.f32.mrf.mxu1  ;;  %v652_v38 = vadd.f32 %v651_v35, %v553_v20  ;;  %1623 = vtanh.f32 %v648_v36 }
 0x1ca   : > { %v653_v39 = vpop.f32.mrf.mxu0  ;;  %v741_v51 = vadd.f32 %v740_v37, %v553_v20 }
 0x1cb   : > { %v654_v40 = vadd.f32 %v653_v39, %v553_v20  ;;  %v742_v41 = vpop.f32.mrf.mxu1  ;;  %1625 = vtanh.f32 %v652_v38 }
 0x1cc   : > { %v657_v42 = vpop.f32.mrf.mxu0  ;;  %v743_v49 = vadd.f32 %v742_v41, %v553_v20  ;;  %v780_v20 = vpop.permute.xlu1 %779 }
 0x1cd   : > { %v658_v43 = vadd.f32 %v657_v42, %v558_v22  ;;  %v746_v44 = vpop.f32.mrf.mxu1  ;;  %1627 = vtanh.f32 %v654_v40 }
 0x1ce   : > { %v659_v45 = vpop.f32.mrf.mxu0  ;;  %v747_v46 = vadd.f32 %v746_v44, %v558_v22 }
 0x1cf   : > { %v660_v47 = vadd.f32 %v659_v45, %v558_v22  ;;  %v748_v48 = vpop.f32.mrf.mxu1  ;;  %1629 = vtanh.f32 %v658_v43 }
 0x1d0   : > { %v749_v50 = vadd.f32 %v748_v48, %v558_v22  ;;  %v1618_v56 = vpop.eup %1617 }
 0x1d1   : > { %1631 = vtanh.f32 %v660_v47 }
 0x1d2   : > { %1633 = vtanh.f32 %v749_v50  ;;  %v1620_v57 = vpop.eup %1619 }
 0x1d3   : > { %1635 = vtanh.f32 %v747_v46 }
 0x1d4   : > { %1637 = vtanh.f32 %v743_v49  ;;  %v1622_v58 = vpop.eup %1621 }
 0x1d5   : > { %1639 = vtanh.f32 %v741_v51 }
 0x1d6   : > { %1641 = vtanh.f32 %v737_v52  ;;  %v1624_v59 = vpop.eup %1623 }
 0x1d7   : > { %1643 = vtanh.f32 %v735_v53 }
 0x1d8   : > { %1645 = vtanh.f32 %v731_v54  ;;  %v1626_v60 = vpop.eup %1625 }
 0x1d9   : > { %1647 = vtanh.f32 %v729_v55 }
 0x1da   : > { %v1628_v61 = vpop.eup %1627 }
 0x1dc   : > { %v1630_v62 = vpop.eup %1629 }
 0x1de   : > { %v1632_v63 = vpop.eup %1631 }
 0x1df   : > { %v1634_v1 = vpop.eup %1633  ;;  %833 = vmatprep.subr.mxu0 %v1632_v63  ;;  %v1518_v63 = vld [vmem:[%s2083_s3 + $0x40] sm:$0xff] }
 0x1e0   : > { %v1636_v2 = vpop.eup %1635  ;;  %922 = vmatprep.subr.mxu1 %v1634_v1  ;;  %834 = vmatpush1.msra.mxu0 %v1630_v62 }
 0x1e1   : > { %v1638_v3 = vpop.eup %1637  ;;  %923 = vmatpush1.msra.mxu1 %v1636_v2  ;;  %835 = vmatprep.subr.mxu0 %v1628_v61 }
 0x1e2   : > { %v1640_v4 = vpop.eup %1639  ;;  %924 = vmatprep.subr.mxu1 %v1638_v3  ;;  %836 = vmatpush1.msra.mxu0 %v1626_v60  ;;  %v1519_v3 = vld [vmem:[%s2083_s3 + $0x48] sm:$0xff] }
 0x1e3   : > { %v1642_v5 = vpop.eup %1641  ;;  %925 = vmatpush1.msra.mxu1 %v1640_v4  ;;  %837 = vmatprep.subr.mxu0 %v1624_v59  ;;  %v1520_v4 = vld [vmem:[%s2083_s3 + $0x50] sm:$0xff] }
 0x1e4   : > { %v1644_v6 = vpop.eup %1643  ;;  %926 = vmatprep.subr.mxu1 %v1642_v5  ;;  %838 = vmatpush1.msra.mxu0 %v1622_v58  ;;  %v1521_v5 = vld [vmem:[%s2083_s3 + $0x58] sm:$0xff] }
 0x1e5   : > { %v1646_v8 = vpop.eup %1645  ;;  %927 = vmatpush1.msra.mxu1 %v1644_v6  ;;  %839 = vmatprep.subr.mxu0 %v1620_v57  ;;  %v1026_v6 = vpop.permute.xlu1 %1025 }
 0x1e6   : > { %v1648_v9 = vpop.eup %1647  ;;  %928 = vmatprep.subr.mxu1 %v1646_v8  ;;  %840 = vmatpush1.msra.mxu0 %v1618_v56  ;;  %v1031_v8 = vpop.permute.xlu0 %1030 }
 0x1e7   : > { %929 = vmatpush1.msra.mxu1 %v1648_v9  ;;  %1510 = vmatmul.mubr.msk.f32.vlgmr.msra.gmra.mxu0 %vm560_vm2, %v1502_v7 }
 0x1e8   : > { %1514 = vmatmul.mubr.msk.f32.vlgmr.msra.gmra.mxu1 %vm560_vm2, %v1502_v7  ;;  %879 = vmatprep.mubr.f32.mxu0 %v1775_v0 }
 0x1e9   : > { %968 = vmatprep.mubr.f32.mxu1 %v1775_v0 }
 0x1eb   : > { %1511 = vmatmul.mubr.msk.f32.gmra.mxu0 %vm560_vm2, %v1503_v10 }
 0x1ec   : > { %1515 = vmatmul.mubr.msk.f32.gmra.mxu1 %vm560_vm2, %v1503_v10  ;;  %885 = vmatprep.mubr.f32.mxu0 %v1775_v0 }
 0x1ed   : > { %974 = vmatprep.mubr.f32.mxu1 %v1775_v0 }
 0x1ef   : > { %1512 = vmatmul.mubr.msk.f32.gmra.mxu0 %vm560_vm2, %v1504_v11 }
 0x1f0   : > { %1516 = vmatmul.mubr.msk.f32.gmra.mxu1 %vm560_vm2, %v1504_v11  ;;  %891 = vmatprep.mubr.f32.mxu0 %v1775_v0 }
 0x1f1   : > { %980 = vmatprep.mubr.f32.mxu1 %v1775_v0 }
 0x1f3   : > { %1513 = vmatmul.mubr.msk.f32.gmra.mxu0 %vm560_vm2, %v1505_v12 }
 0x1f4   : > { %1517 = vmatmul.mubr.msk.f32.gmra.mxu1 %vm560_vm2, %v1505_v12  ;;  %1109 = vmatprep.mubr.f32.mxu0 %v1775_v0 }
 0x1f5   : > { %1198 = vmatprep.mubr.f32.mxu1 %v1775_v0 }
 0x2a7   : > { %v875_v14 = vpop.f32.mrf.mxu0 }
 0x2a8   : > { %v964_v16 = vpop.f32.mrf.mxu1  ;;  %v876_v22 = vadd.f32 %v875_v14, %v780_v20 }
 0x2a9   : > { %v877_v17 = vpop.f32.mrf.mxu0  ;;  %v965_v48 = vadd.f32 %v964_v16, %v780_v20 }
 0x2aa   : > { %v966_v18 = vpop.f32.mrf.mxu1  ;;  %v878_v25 = vadd.f32 %v877_v17, %v780_v20  ;;  %1649 = vtanh.f32 %v876_v22  ;;  %v1021_v17 = vpop.permute.xlu0 %1020 }
 0x2ab   : > { %v881_v19 = vpop.f32.mrf.mxu0  ;;  %v967_v47 = vadd.f32 %v966_v18, %v780_v20 }
 0x2ac   : > { %v970_v21 = vpop.f32.mrf.mxu1  ;;  %v882_v27 = vadd.f32 %v881_v19, %v785_v24  ;;  %1651 = vtanh.f32 %v878_v25 }
 0x2ad   : > { %v883_v23 = vpop.f32.mrf.mxu0  ;;  %v971_v46 = vadd.f32 %v970_v21, %v785_v24 }
 0x2ae   : > { %v972_v26 = vpop.f32.mrf.mxu1  ;;  %v884_v29 = vadd.f32 %v883_v23, %v785_v24  ;;  %1653 = vtanh.f32 %v882_v27 }
 0x2af   : > { %v887_v28 = vpop.f32.mrf.mxu0  ;;  %v973_v45 = vadd.f32 %v972_v26, %v785_v24 }
 0x2b0   : > { %v976_v30 = vpop.f32.mrf.mxu1  ;;  %v888_v31 = vadd.f32 %v887_v28, %v790_v13  ;;  %1655 = vtanh.f32 %v884_v29 }
 0x2b1   : > { %v889_v32 = vpop.f32.mrf.mxu0  ;;  %v977_v44 = vadd.f32 %v976_v30, %v790_v13 }
 0x2b2   : > { %v890_v33 = vadd.f32 %v889_v32, %v790_v13  ;;  %v978_v34 = vpop.f32.mrf.mxu1  ;;  %1657 = vtanh.f32 %v888_v31 }
 0x2b3   : > { %v893_v35 = vpop.f32.mrf.mxu0  ;;  %v979_v42 = vadd.f32 %v978_v34, %v790_v13  ;;  %v1016_v13 = vpop.permute.xlu1 %1015 }
 0x2b4   : > { %v894_v36 = vadd.f32 %v893_v35, %v795_v15  ;;  %v982_v37 = vpop.f32.mrf.mxu1  ;;  %1659 = vtanh.f32 %v890_v33 }
 0x2b5   : > { %v895_v38 = vpop.f32.mrf.mxu0  ;;  %v983_v39 = vadd.f32 %v982_v37, %v795_v15 }
 0x2b6   : > { %v896_v40 = vadd.f32 %v895_v38, %v795_v15  ;;  %v984_v41 = vpop.f32.mrf.mxu1  ;;  %1661 = vtanh.f32 %v894_v36 }
 0x2b7   : > { %v985_v43 = vadd.f32 %v984_v41, %v795_v15  ;;  %v1650_v49 = vpop.eup %1649 }
 0x2b8   : > { %1663 = vtanh.f32 %v896_v40 }
 0x2b9   : > { %1665 = vtanh.f32 %v985_v43  ;;  %v1652_v50 = vpop.eup %1651 }
 0x2ba   : > { %1667 = vtanh.f32 %v983_v39 }
 0x2bb   : > { %1669 = vtanh.f32 %v979_v42  ;;  %v1654_v51 = vpop.eup %1653 }
 0x2bc   : > { %1671 = vtanh.f32 %v977_v44 }
 0x2bd   : > { %1673 = vtanh.f32 %v973_v45  ;;  %v1656_v52 = vpop.eup %1655 }
 0x2be   : > { %1675 = vtanh.f32 %v971_v46 }
 0x2bf   : > { %1677 = vtanh.f32 %v967_v47  ;;  %v1658_v53 = vpop.eup %1657 }
 0x2c0   : > { %1679 = vtanh.f32 %v965_v48 }
 0x2c1   : > { %v1660_v54 = vpop.eup %1659 }
 0x2c3   : > { %v1662_v55 = vpop.eup %1661 }
 0x2c5   : > { %v1664_v56 = vpop.eup %1663 }
 0x2c6   : > { %v1666_v57 = vpop.eup %1665  ;;  %1069 = vmatprep.subr.mxu0 %v1664_v56 }
 0x2c7   : > { %v1668_v58 = vpop.eup %1667  ;;  %1158 = vmatprep.subr.mxu1 %v1666_v57  ;;  %1070 = vmatpush1.msra.mxu0 %v1662_v55  ;;  %v1239_v55 = vld [vmem:[%s2085_s5] sm:$0xf] }
 0x2c8   : > { %v1670_v59 = vpop.eup %1669  ;;  %1159 = vmatpush1.msra.mxu1 %v1668_v58  ;;  %1071 = vmatprep.subr.mxu0 %v1660_v54 }
 0x2c9   : > { %v1672_v60 = vpop.eup %1671  ;;  %1160 = vmatprep.subr.mxu1 %v1670_v59  ;;  %1072 = vmatpush1.msra.mxu0 %v1658_v53 }
 0x2ca   : > { %v1674_v61 = vpop.eup %1673  ;;  %1161 = vmatpush1.msra.mxu1 %v1672_v60  ;;  %1073 = vmatprep.subr.mxu0 %v1656_v52  ;;  %v1244_v60 = vpop.permute.xlu0 %1243 }
 0x2cb   : > { %v1676_v62 = vpop.eup %1675  ;;  %1162 = vmatprep.subr.mxu1 %v1674_v61  ;;  %1074 = vmatpush1.msra.mxu0 %v1654_v51 }
 0x2cc   : > { %v1678_v1 = vpop.eup %1677  ;;  %1163 = vmatpush1.msra.mxu1 %v1676_v62  ;;  %1075 = vmatprep.subr.mxu0 %v1652_v50 }
 0x2cd   : > { %v1680_v2 = vpop.eup %1679  ;;  %1164 = vmatprep.subr.mxu1 %v1678_v1  ;;  %1076 = vmatpush1.msra.mxu0 %v1650_v49 }
 0x2ce   : > { %1165 = vmatpush1.msra.mxu1 %v1680_v2  ;;  %1526 = vmatmul.mubr.msk.f32.vlgmr.msra.gmra.mxu0 %vm560_vm2, %v1518_v63 }
 0x2cf   : > { %1530 = vmatmul.mubr.msk.f32.vlgmr.msra.gmra.mxu1 %vm560_vm2, %v1518_v63  ;;  %1115 = vmatprep.mubr.f32.mxu0 %v1775_v0 }
 0x2d0   : > { %1204 = vmatprep.mubr.f32.mxu1 %v1775_v0 }
 0x2d2   : > { %1527 = vmatmul.mubr.msk.f32.gmra.mxu0 %vm560_vm2, %v1519_v3 }
 0x2d3   : > { %1531 = vmatmul.mubr.msk.f32.gmra.mxu1 %vm560_vm2, %v1519_v3  ;;  %1121 = vmatprep.mubr.f32.mxu0 %v1775_v0 }
 0x2d4   : > { %1210 = vmatprep.mubr.f32.mxu1 %v1775_v0 }
 0x2d6   : > { %1528 = vmatmul.mubr.msk.f32.gmra.mxu0 %vm560_vm2, %v1520_v4 }
 0x2d7   : > { %1532 = vmatmul.mubr.msk.f32.gmra.mxu1 %vm560_vm2, %v1520_v4  ;;  %1127 = vmatprep.mubr.f32.mxu0 %v1775_v0 }
 0x2d8   : > { %1216 = vmatprep.mubr.f32.mxu1 %v1775_v0 }
 0x2da   : > { %1529 = vmatmul.mubr.msk.f32.gmra.mxu0 %vm560_vm2, %v1521_v5 }
 0x2db   : > { %1533 = vmatmul.mubr.msk.f32.gmra.mxu1 %vm560_vm2, %v1521_v5  ;;  %1313 = vmatprep.mubr.f32.mxu0 %v1775_v0 }
 0x2dc   : > { %1384 = vmatprep.mubr.f32.mxu1 %v1775_v0 }
 0x38e   : > { %v1111_v7 = vpop.f32.mrf.mxu0 }
 0x38f   : > { %v1200_v9 = vpop.f32.mrf.mxu1  ;;  %v1112_v15 = vadd.f32 %v1111_v7, %v1016_v13 }
 0x390   : > { %v1113_v10 = vpop.f32.mrf.mxu0  ;;  %v1201_v40 = vadd.f32 %v1200_v9, %v1016_v13 }
 0x391   : > { %v1202_v11 = vpop.f32.mrf.mxu1  ;;  %v1114_v18 = vadd.f32 %v1113_v10, %v1016_v13  ;;  %1681 = vtanh.f32 %v1112_v15 }
 0x392   : > { %v1117_v12 = vpop.f32.mrf.mxu0  ;;  %v1203_v39 = vadd.f32 %v1202_v11, %v1016_v13 }
 0x393   : > { %v1206_v14 = vpop.f32.mrf.mxu1  ;;  %v1118_v20 = vadd.f32 %v1117_v12, %v1021_v17  ;;  %1683 = vtanh.f32 %v1114_v18 }
 0x394   : > { %v1119_v16 = vpop.f32.mrf.mxu0  ;;  %v1207_v38 = vadd.f32 %v1206_v14, %v1021_v17 }
 0x395   : > { %v1208_v19 = vpop.f32.mrf.mxu1  ;;  %v1120_v22 = vadd.f32 %v1119_v16, %v1021_v17  ;;  %1685 = vtanh.f32 %v1118_v20 }
 0x396   : > { %v1123_v21 = vpop.f32.mrf.mxu0  ;;  %v1209_v37 = vadd.f32 %v1208_v19, %v1021_v17 }
 0x397   : > { %v1212_v23 = vpop.f32.mrf.mxu1  ;;  %v1124_v0 = vadd.f32 %v1123_v21, %v1026_v6  ;;  %1687 = vtanh.f32 %v1120_v22 }
 0x398   : > { %v1125_v24 = vpop.f32.mrf.mxu0  ;;  %v1213_v36 = vadd.f32 %v1212_v23, %v1026_v6 }
 0x399   : > { %v1126_v25 = vadd.f32 %v1125_v24, %v1026_v6  ;;  %v1214_v26 = vpop.f32.mrf.mxu1  ;;  %1689 = vtanh.f32 %v1124_v0 }
 0x39a   : > { %v1129_v27 = vpop.f32.mrf.mxu0  ;;  %v1215_v34 = vadd.f32 %v1214_v26, %v1026_v6 }
 0x39b   : > { %v1130_v28 = vadd.f32 %v1129_v27, %v1031_v8  ;;  %v1218_v29 = vpop.f32.mrf.mxu1  ;;  %1691 = vtanh.f32 %v1126_v25 }
 0x39c   : > { %v1131_v30 = vpop.f32.mrf.mxu0  ;;  %v1219_v31 = vadd.f32 %v1218_v29, %v1031_v8 }
 0x39d   : > { %v1132_v32 = vadd.f32 %v1131_v30, %v1031_v8  ;;  %v1220_v33 = vpop.f32.mrf.mxu1  ;;  %1693 = vtanh.f32 %v1130_v28 }
 0x39e   : > { %v1221_v35 = vadd.f32 %v1220_v33, %v1031_v8  ;;  %v1682_v41 = vpop.eup %1681 }
 0x39f   : > { %1695 = vtanh.f32 %v1132_v32 }
 0x3a0   : > { %1697 = vtanh.f32 %v1221_v35  ;;  %v1684_v42 = vpop.eup %1683 }
 0x3a1   : > { %1699 = vtanh.f32 %v1219_v31 }
 0x3a2   : > { %1701 = vtanh.f32 %v1215_v34  ;;  %v1686_v43 = vpop.eup %1685 }
 0x3a3   : > { %1703 = vtanh.f32 %v1213_v36 }
 0x3a4   : > { %1705 = vtanh.f32 %v1209_v37  ;;  %v1688_v44 = vpop.eup %1687 }
 0x3a5   : > { %1707 = vtanh.f32 %v1207_v38 }
 0x3a6   : > { %1709 = vtanh.f32 %v1203_v39  ;;  %v1690_v45 = vpop.eup %1689 }
 0x3a7   : > { %1711 = vtanh.f32 %v1201_v40 }
 0x3a8   : > { %v1692_v46 = vpop.eup %1691 }
 0x3aa   : > { %v1694_v47 = vpop.eup %1693 }
 0x3ac   : > { %v1696_v48 = vpop.eup %1695 }
 0x3ad   : > { %v1698_v49 = vpop.eup %1697  ;;  %1273 = vmatprep.subr.mxu0 %v1696_v48 }
 0x3ae   : > { %v1700_v50 = vpop.eup %1699  ;;  %1344 = vmatprep.subr.mxu1 %v1698_v49  ;;  %1274 = vmatpush1.msra.mxu0 %v1694_v47 }
 0x3af   : > { %v1702_v51 = vpop.eup %1701  ;;  %1345 = vmatpush1.msra.mxu1 %v1700_v50  ;;  %1275 = vmatprep.subr.mxu0 %v1692_v46 }
 0x3b0   : > { %v1704_v52 = vpop.eup %1703  ;;  %1346 = vmatprep.subr.mxu1 %v1702_v51  ;;  %1276 = vmatpush1.msra.mxu0 %v1690_v45 }
 0x3b1   : > { %v1706_v53 = vpop.eup %1705  ;;  %1347 = vmatpush1.msra.mxu1 %v1704_v52  ;;  %1277 = vmatprep.subr.mxu0 %v1688_v44 }
 0x3b2   : > { %v1708_v54 = vpop.eup %1707  ;;  %1348 = vmatprep.subr.mxu1 %v1706_v53  ;;  %1278 = vmatpush1.msra.mxu0 %v1686_v43 }
 0x3b3   : > { %v1710_v56 = vpop.eup %1709  ;;  %1349 = vmatpush1.msra.mxu1 %v1708_v54  ;;  %1279 = vmatprep.subr.mxu0 %v1684_v42 }
 0x3b4   : > { %v1712_v57 = vpop.eup %1711  ;;  %1350 = vmatprep.subr.mxu1 %v1710_v56  ;;  %1280 = vmatpush1.msra.mxu0 %v1682_v41 }
 0x3b5   : > { %1351 = vmatpush1.msra.mxu1 %v1712_v57  ;;  %1534 = vmatmul.mubr.msk.f32.vlgmr.msra.gmra.mxu0 %vm560_vm2, %v1239_v55 }
 0x3b6   : > { %1535 = vmatmul.mubr.msk.f32.vlgmr.msra.gmra.mxu1 %vm560_vm2, %v1239_v55 }
 0x475   : > { %v1315_v58 = vpop.f32.mrf.mxu0 }
 0x476   : > { %v1386_v59 = vpop.f32.mrf.mxu1  ;;  %v1316_v62 = vadd.f32 %v1315_v58, %v1244_v60 }
 0x477   : > { %v1317_v61 = vpop.f32.mrf.mxu0  ;;  %v1387_v2 = vadd.f32 %v1386_v59, %v1244_v60 }
 0x478   : > { %v1318_v63 = vadd.f32 %v1317_v61, %v1244_v60  ;;  %v1388_v1 = vpop.f32.mrf.mxu1 }
 0x479   : > { %v1389_v3 = vadd.f32 %v1388_v1, %v1244_v60 }
 0x47a   : > { %v1395_v4 = vcombine.low %v1316_v62, %v1318_v63 }
 0x47b   : > { %v1396_v5 = vcombine.low %v1387_v2, %v1389_v3 }
 0x47c   : > { %1399 = vst [vmem:[%s272_s19] sm:$0xff] %v1395_v4 }
 0x47d   : > { %1400 = vst [vmem:[%s272_s19 + $0x8] sm:$0xff] %v1396_v5 }
 0x47e   : > { %1726 = shalt.err (!%p1723_p3)
}
 0x47f   : > { %s1727_s13 = scalar_lea.hbm %s2045_s23, 256  ;;  %s1731_s17 = scalar_lea.hbm %s2087_s7, 512 }
 0x480   : > { %p1728_p4 = scmp.ne.s32.totalorder %s2045_s23, %s1727_s13  ;;  %p1732_p9 = scmp.lt.s32.totalorder %s2045_s23, %s2087_s7 }
 0x481   : > { %p1733_p10 = scmp.lt.s32.totalorder %s1731_s17, %s1727_s13 }
 0x482   : > { %p1729_p7 = pnand %p1728_p4, %p1856_p5 }
 0x483   : > { %p1734_p11 = por %p1733_p10, %p1732_p9 }
 0x484   : > { %p1730_p8 = pneg %p1729_p7 }
 0x486   : > { %p1735_p12 = pnand %p1734_p11, %p1730_p8 }
 0x488   : > { %1738 = shalt.err (!%p1735_p12)
}
 0x489   : > { %1542 = dma.vmem_to_hbm [thread:$0]  (%p1856_p5), %s1417_s20, 256, %s2045_s23, %s1402_s29  }
 0x48a PF: > { %p1548_p13 = scmp.ge.s32.totalorder %s1773_s27, 2  ;;  %s1428_s21 = sand.u32 1, %s1761_s24  }
 0x48b   : > { %s1429_s22 = scalar_lea.sflag [#allocation3], %s1428_s21 }
 0x48c   : > { %p1545_p0 = pnand %p1548_p13, %p1860_p6 }
 0x48e   : > { %p1546_p1 = pneg %p1545_p0 }
 0x490   : > { %1756 = dma.done.wait (%p1546_p1), %s1429_s22, 256  }
 0x491   : > { %1758 = vsyncadd (%p1546_p1), %s1429_s22, 4294967040  ;;  %p17_p2 = scmp.ge.s32.totalorder %s1843_s30, 4   ;;  %s2090_s24 = smov %s1765_s25 }
 0x492   : > { %s2091_s25 = smov %s1769_s26  ;;  %s2092_s26 = smov %s1854_s10 }
 0x493   : > { %s2093_s27 = smov %s1843_s30  ;;  %19 = sbr.rel (!%p17_p2) target bundleno = 3 (0x3), region = 87 }
 0x498   :  { %1434 = vsyncpa [#allocation3], 1 }
 0x499   :  { %1436 = vsyncpa [#allocation3 + $0x1], 1 }

</bundles_post_ra>
